<compile_context>
chip_gen: v5e
topology: v5e:2x2
jax: 0.10.0
libtpu: 0.0.40
codegen_flags: <defaults>
</compile_context>

<pallas_src>
import functools

import jax
import jax.numpy as jnp
from jax.experimental import pallas as pl
from jax.experimental.pallas import tpu as pltpu


# ---------------------------------------------------------------------------
# Fused Pallas kernel: grid axis = layer index; activations live in VMEM scratch.
# ---------------------------------------------------------------------------
def _fused_mlp_kernel(x_ref, gamma_ref, beta_ref, w_ref, b_ref, o_ref, act_ref, *,
                      num_layers, n_valid, d_out_valid, hidden_act, eps):
    l = pl.program_id(0)

    # Stage the (padded) network input into the ping-pong read slot once.
    @pl.when(l == 0)
    def _():
        act_ref[1] = x_ref[...]

    read_slot = 1 - (l % 2)
    write_slot = l % 2

    x = act_ref[read_slot]                                # [N_pad, D_pad] f32
    n_pad, d_pad = x.shape

    # ---- BatchNorm1d (training-mode batch statistics, biased variance) ----
    if n_pad != n_valid:
        # Padded batch rows must not pollute the full-batch statistics.
        row_ids = jax.lax.broadcasted_iota(jnp.int32, (n_pad, d_pad), 0)
        xm = jnp.where(row_ids < n_valid, x, 0.0)
    else:
        xm = x
    inv_n = 1.0 / float(n_valid)
    mean = jnp.sum(xm, axis=0, keepdims=True) * inv_n      # [1, D_pad]
    ex2 = jnp.sum(xm * xm, axis=0, keepdims=True) * inv_n
    var = jnp.maximum(ex2 - mean * mean, 0.0)
    scale = gamma_ref[0] * jax.lax.rsqrt(var + eps)        # 0 on padded columns (gamma padded 0)
    shift = beta_ref[0] - mean * scale                     # 0 on padded columns (beta  padded 0)
    x_norm = x * scale + shift                             # single FMA pass over x

    # ---- Linear (MXU; operands in the weight-storage dtype, f32 accumulate) ----
    w = w_ref[0]                                           # [D_pad, D_pad]
    y = jnp.dot(x_norm.astype(w.dtype), w, preferred_element_type=jnp.float32)
    y = y + b_ref[0]                                       # [1, D_pad]

    # ---- Activation ----
    is_last = l == num_layers - 1

    @pl.when(jnp.logical_not(is_last))
    def _():
        if hidden_act == "tanh":
            h = jnp.tanh(y)
        elif hidden_act == "sigmoid":
            h = 0.5 * (jnp.tanh(0.5 * y) + 1.0)            # EUP tanh instead of VPU divide
        elif hidden_act == "relu":
            h = jnp.maximum(y, 0.0)
        else:
            raise ValueError(f"unknown activation: {hidden_act}")
        act_ref[write_slot] = h

    @pl.when(is_last)
    def _():
        logits = y
        if d_out_valid != d_pad:
            col_ids = jax.lax.broadcasted_iota(jnp.int32, y.shape, 1)
            logits = jnp.where(col_ids < d_out_valid, y, -jnp.inf)  # mask padded logits
        m = jnp.max(logits, axis=-1, keepdims=True)
        e = jnp.exp(logits - m)
        denom = jnp.sum(e, axis=-1, keepdims=True)
        o_ref[...] = (e * pl.reciprocal(denom, approx=True)).astype(o_ref.dtype)


def _round_up(v, m):
    return ((v + m - 1) // m) * m


# ---------------------------------------------------------------------------
# Wrapper: pad to lane-dense shapes, stack per-layer params, single pallas_call.
# ---------------------------------------------------------------------------
def deep_neural_network_forward(params, layer_config, x, *, eps=1e-5):
    n, d_in0 = x.shape
    num_layers = len(layer_config)
    assert num_layers >= 1
    hidden_act = layer_config[0][2] if num_layers > 1 else "tanh"
    d_out_last = layer_config[-1][1]

    d_pad = max(_round_up(max(di, do), 128) for di, do, _ in layer_config)
    n_pad = _round_up(n, 8)

    # bf16 MXU operands (f32 accumulate) once the padded contraction dim is big enough to matter;
    # exact f32 for small layers so results match the PyTorch f32 forward.
    mxu_dtype = jnp.bfloat16 if d_pad >= 256 else jnp.float32

    # Zero padding keeps padded feature columns exactly zero through BN (gamma=beta=0 -> scale=
    # shift=0) and through the matmul (padded W rows/cols and b entries are zero).
    gammas = jnp.zeros((num_layers, 1, d_pad), jnp.float32)
    betas = jnp.zeros((num_layers, 1, d_pad), jnp.float32)
    ws = jnp.zeros((num_layers, d_pad, d_pad), mxu_dtype)
    bs = jnp.zeros((num_layers, 1, d_pad), jnp.float32)
    for i, (p, (d_in, d_out, _act)) in enumerate(zip(params, layer_config)):
        gammas = gammas.at[i, 0, :d_in].set(p["gamma"].astype(jnp.float32))
        betas = betas.at[i, 0, :d_in].set(p["beta"].astype(jnp.float32))
        ws = ws.at[i, :d_in, :d_out].set(p["w"].astype(mxu_dtype))
        bs = bs.at[i, 0, :d_out].set(p["b"].astype(jnp.float32))
    x_pad = jnp.zeros((n_pad, d_pad), jnp.float32).at[:n, :d_in0].set(x.astype(jnp.float32))

    # VMEM budget estimate (double-buffered weights dominate for big layers); cap at v7x's 64 MiB.
    itemsize = jnp.dtype(mxu_dtype).itemsize
    est = (2 * d_pad * d_pad * itemsize        # W[l] double-buffered across the layer grid
           + 2 * 3 * 2 * d_pad * 4             # gamma/beta/b
           + 2 * n_pad * d_pad * 4             # padded input
           + n_pad * d_pad * 4                 # resident output block
           + 2 * n_pad * d_pad * 4)            # ping-pong activation scratch
    cp_kwargs = dict(dimension_semantics=("arbitrary",))   # layers are sequentially dependent
    if est > (16 << 20):
        cp_kwargs["vmem_limit_bytes"] = int(min(2 * est, 64 << 20))
    # TODO(synk): layers whose padded (d_pad x d_pad) weight block cannot fit v7x's 64 MiB VMEM
    #             need an inner K/N tiling (pltpu.emit_pipeline) inside the layer loop.
    # TODO(synk): splitting the batch across v7x's two TensorCores requires a separate full-batch
    #             BN-stats pass per layer; kept a single sequential layer grid here.

    grid_spec = pltpu.PrefetchScalarGridSpec(
        num_scalar_prefetch=0,
        grid=(num_layers,),
        in_specs=[
            pl.BlockSpec((n_pad, d_pad), lambda l: (0, 0)),        # padded input (resident)
            pl.BlockSpec((1, 1, d_pad), lambda l: (l, 0, 0)),       # gamma[l]
            pl.BlockSpec((1, 1, d_pad), lambda l: (l, 0, 0)),       # beta[l]
            pl.BlockSpec((1, d_pad, d_pad), lambda l: (l, 0, 0)),   # W[l] (pipelined DMA)
            pl.BlockSpec((1, 1, d_pad), lambda l: (l, 0, 0)),       # b[l]
        ],
        out_specs=pl.BlockSpec((n_pad, d_pad), lambda l: (0, 0)),   # lane-dense output slab
        scratch_shapes=[pltpu.VMEM((2, n_pad, d_pad), jnp.float32)],
    )

    out_pad = pl.pallas_call(
        functools.partial(
            _fused_mlp_kernel,
            num_layers=num_layers, n_valid=n, d_out_valid=d_out_last,
            hidden_act=hidden_act, eps=eps),
        out_shape=jax.ShapeDtypeStruct((n_pad, d_pad), jnp.float32),
        grid_spec=grid_spec,
        compiler_params=pltpu.CompilerParams(**cp_kwargs),
    )(x_pad, gammas, betas, ws, bs)

    return out_pad[:n, :d_out_last]


# ---------------------------------------------------------------------------
# Parameter setup (mirrors DeepNeuralNetwork.__init__) + pure-JAX reference.
# ---------------------------------------------------------------------------
def build_layer_config(nn_input_dim, nn_num_layers, nn_hidden_dim, nn_output_dim,
                       actFun_type="tanh"):
    if isinstance(nn_hidden_dim, list):
        hidden_dims = nn_hidden_dim
    else:
        hidden_dims = [nn_hidden_dim] * (nn_num_layers - 2)

    layers = []  # list of (d_in, d_out, activation)
    if len(hidden_dims) == 0:
        layers.append((nn_input_dim, nn_output_dim, "softmax"))
    else:
        dims = [nn_input_dim] + hidden_dims
        for i in range(len(dims) - 1):
            layers.append((dims[i], dims[i + 1], actFun_type))
        layers.append((hidden_dims[-1], nn_output_dim, "softmax"))
    return layers


def init_params(key, layer_config):
    """Deterministic init mimicking PyTorch defaults:
       Linear weight/bias ~ U(-1/sqrt(fan_in), 1/sqrt(fan_in)); BN gamma=1, beta=0.
       NOTE: BN running_mean/running_var buffers are not tracked (single forward pass)."""
    params = []
    for (d_in, d_out, _act) in layer_config:
        key, kw, kb = jax.random.split(key, 3)
        bound = 1.0 / jnp.sqrt(jnp.asarray(d_in, jnp.float32))
        w = jax.random.uniform(kw, (d_in, d_out), jnp.float32, -bound, bound)
        b = jax.random.uniform(kb, (d_out,), jnp.float32, -bound, bound)
        gamma = jnp.ones((d_in,), jnp.float32)
        beta = jnp.zeros((d_in,), jnp.float32)
        params.append({"gamma": gamma, "beta": beta, "w": w, "b": b})
    return params


def _reference_forward(params, layer_config, x, *, eps=1e-5):
    """Plain-JAX reference of the same forward pass (for a numerical sanity check)."""
    y = x.astype(jnp.float32)
    for p, (_d_in, _d_out, act) in zip(params, layer_config):
        mean = jnp.mean(y, axis=0, keepdims=True)
        var = jnp.mean((y - mean) ** 2, axis=0, keepdims=True)
        y = (y - mean) / jnp.sqrt(var + eps) * p["gamma"] + p["beta"]
        y = y @ p["w"] + p["b"]
        if act == "tanh":
            y = jnp.tanh(y)
        elif act == "sigmoid":
            y = jax.nn.sigmoid(y)
        elif act == "relu":
            y = jnp.maximum(y, 0.0)
        elif act == "softmax":
            y = jax.nn.softmax(y, axis=-1)
    return y


# ---------------------------------------------------------------------------
if __name__ == "__main__":
    # Small shapes consistent with the module: 2D input [batch, input_dim]
    batch = 8
    nn_input_dim = 32
    nn_num_layers = 4          # -> 2 hidden layers
    nn_hidden_dim = 32
    nn_output_dim = 4
    actFun_type = "tanh"

    layer_config = build_layer_config(
        nn_input_dim, nn_num_layers, nn_hidden_dim, nn_output_dim, actFun_type
    )

    key = jax.random.PRNGKey(0)
    key, kx, kp = jax.random.split(key, 3)
    x = jax.random.normal(kx, (batch, nn_input_dim), jnp.float32)
    params = init_params(kp, layer_config)

    probs = deep_neural_network_forward(params, layer_config, x)
    probs = jax.block_until_ready(probs)

    assert probs.shape == (batch, nn_output_dim)
    # Softmax rows sum to ~1 (approx-reciprocal denominator -> loose tolerance).
    row_sums = jnp.sum(probs, axis=1)
    assert bool(jnp.all(jnp.abs(row_sums - 1.0) < 1e-2))
    # Match the plain-JAX reference forward.
    ref = _reference_forward(params, layer_config, x)
    assert bool(jnp.all(jnp.abs(probs - ref) < 2e-2))

    print("KERNEL_OK")
</pallas_src>

<mosaic_0001>
module attributes {stable_mosaic.version = 11 : i64} {
  func.func @_fused_mlp_kernel(%arg0: i32, %arg1: memref<8x128xf32, #tpu.memory_space<vmem>>, %arg2: memref<1x1x128xf32, #tpu.memory_space<vmem>>, %arg3: memref<1x1x128xf32, #tpu.memory_space<vmem>>, %arg4: memref<1x128x128xf32, #tpu.memory_space<vmem>>, %arg5: memref<1x1x128xf32, #tpu.memory_space<vmem>>, %arg6: memref<8x128xf32, #tpu.memory_space<vmem>>, %arg7: memref<2x8x128xf32, #tpu.memory_space<vmem>>) attributes {dimension_semantics = [#tpu.dimension_semantics<arbitrary>], iteration_bounds = array<i64: 3>, scalar_prefetch = 0 : i64, scratch_operands = 1 : i64, tpu.core_type = #tpu.core_type<tc>, window_params = [{pipeline_mode = #tpu.pipeline_mode<synchronous>, transform_indices = @transform_0, window_bounds = array<i64: 8, 128>}, {transform_indices = @transform_1, window_bounds = array<i64: 1, 1, 128>}, {transform_indices = @transform_2, window_bounds = array<i64: 1, 1, 128>}, {transform_indices = @transform_3, window_bounds = array<i64: 1, 128, 128>}, {transform_indices = @transform_4, window_bounds = array<i64: 1, 1, 128>}, {pipeline_mode = #tpu.pipeline_mode<synchronous>, transform_indices = @transform_5, window_bounds = array<i64: 8, 128>}]} {
    %c0_i32 = arith.constant 0 : i32
    %0 = arith.cmpi eq, %arg0, %c0_i32 : i32
    %1 = arith.extui %0 : i1 to i32
    %c0_i32_0 = arith.constant 0 : i32
    %2 = arith.cmpi ne, %1, %c0_i32_0 : i32
    scf.if %2 {
      %c0_34 = arith.constant 0 : index
      %c0_35 = arith.constant 0 : index
      %67 = vector.load %arg1[%c0_34, %c0_35] : memref<8x128xf32, #tpu.memory_space<vmem>>, vector<8x128xf32>
      %c1 = arith.constant 1 : index
      %c0_36 = arith.constant 0 : index
      %c0_37 = arith.constant 0 : index
      %68 = vector.load %arg7[%c1, %c0_36, %c0_37] : memref<2x8x128xf32, #tpu.memory_space<vmem>>, vector<1x8x128xf32>
      %69 = vector.shape_cast %68 : vector<1x8x128xf32> to vector<8x128xf32>
      %70 = vector.shape_cast %67 : vector<8x128xf32> to vector<1x8x128xf32>
      tpu.vector_store %arg7[%c1, %c0_36, %c0_37], %70 {strides = array<i32>} : memref<2x8x128xf32, #tpu.memory_space<vmem>>, vector<1x8x128xf32>,
    } else {
    }
    %c2_i32 = arith.constant 2 : i32
    %c0_i32_1 = arith.constant 0 : i32
    %3 = arith.cmpi eq, %c2_i32, %c0_i32_1 : i32
    %c1_i32 = arith.constant 1 : i32
    %4 = arith.select %3, %c1_i32, %c2_i32 : i32
    %5 = arith.remsi %arg0, %4 : i32
    %c0_i32_2 = arith.constant 0 : i32
    %6 = arith.cmpi ne, %5, %c0_i32_2 : i32
    %c0_i32_3 = arith.constant 0 : i32
    %7 = arith.cmpi slt, %5, %c0_i32_3 : i32
    %c0_i32_4 = arith.constant 0 : i32
    %8 = arith.cmpi slt, %4, %c0_i32_4 : i32
    %9 = arith.xori %7, %8 : i1
    %10 = arith.andi %9, %6 : i1
    %11 = arith.addi %5, %4 : i32
    %12 = arith.select %10, %11, %5 : i32
    %c1_i32_5 = arith.constant 1 : i32
    %13 = arith.subi %c1_i32_5, %12 : i32
    %c2_i32_6 = arith.constant 2 : i32
    %c0_i32_7 = arith.constant 0 : i32
    %14 = arith.cmpi eq, %c2_i32_6, %c0_i32_7 : i32
    %c1_i32_8 = arith.constant 1 : i32
    %15 = arith.select %14, %c1_i32_8, %c2_i32_6 : i32
    %16 = arith.remsi %arg0, %15 : i32
    %c0_i32_9 = arith.constant 0 : i32
    %17 = arith.cmpi ne, %16, %c0_i32_9 : i32
    %c0_i32_10 = arith.constant 0 : i32
    %18 = arith.cmpi slt, %16, %c0_i32_10 : i32
    %c0_i32_11 = arith.constant 0 : i32
    %19 = arith.cmpi slt, %15, %c0_i32_11 : i32
    %20 = arith.xori %18, %19 : i1
    %21 = arith.andi %20, %17 : i1
    %22 = arith.addi %16, %15 : i32
    %23 = arith.select %21, %22, %16 : i32
    %24 = arith.index_cast %13 : i32 to index
    %c0 = arith.constant 0 : index
    %c0_12 = arith.constant 0 : index
    %25 = vector.load %arg7[%24, %c0, %c0_12] : memref<2x8x128xf32, #tpu.memory_space<vmem>>, vector<1x8x128xf32>
    %26 = vector.shape_cast %25 : vector<1x8x128xf32> to vector<8x128xf32>
    %cst = arith.constant dense<0.000000e+00> : vector<128xf32>
    %27 = vector.multi_reduction <add>, %26, %cst [0] : vector<8x128xf32> to vector<128xf32>
    %28 = vector.shape_cast %27 : vector<128xf32> to vector<1x128xf32>
    %cst_13 = arith.constant 1.250000e-01 : f32
    %29 = vector.broadcast %cst_13 : f32 to vector<1x128xf32>
    %30 = arith.mulf %28, %29 : vector<1x128xf32>
    %31 = arith.mulf %26, %26 : vector<8x128xf32>
    %cst_14 = arith.constant dense<0.000000e+00> : vector<128xf32>
    %32 = vector.multi_reduction <add>, %31, %cst_14 [0] : vector<8x128xf32> to vector<128xf32>
    %33 = vector.shape_cast %32 : vector<128xf32> to vector<1x128xf32>
    %cst_15 = arith.constant 1.250000e-01 : f32
    %34 = vector.broadcast %cst_15 : f32 to vector<1x128xf32>
    %35 = arith.mulf %33, %34 : vector<1x128xf32>
    %36 = arith.mulf %30, %30 : vector<1x128xf32>
    %37 = arith.subf %35, %36 : vector<1x128xf32>
    %cst_16 = arith.constant 0.000000e+00 : f32
    %38 = vector.broadcast %cst_16 : f32 to vector<1x128xf32>
    %39 = arith.maximumf %37, %38 : vector<1x128xf32>
    %c0_17 = arith.constant 0 : index
    %c0_18 = arith.constant 0 : index
    %c0_19 = arith.constant 0 : index
    %40 = vector.load %arg2[%c0_17, %c0_18, %c0_19] : memref<1x1x128xf32, #tpu.memory_space<vmem>>, vector<1x1x128xf32>
    %41 = vector.shape_cast %40 : vector<1x1x128xf32> to vector<1x128xf32>
    %cst_20 = arith.constant 9.99999974E-6 : f32
    %42 = vector.broadcast %cst_20 : f32 to vector<1x128xf32>
    %43 = arith.addf %39, %42 : vector<1x128xf32>
    %44 = math.rsqrt %43 : vector<1x128xf32>
    %45 = arith.mulf %41, %44 : vector<1x128xf32>
    %c0_21 = arith.constant 0 : index
    %c0_22 = arith.constant 0 : index
    %c0_23 = arith.constant 0 : index
    %46 = vector.load %arg3[%c0_21, %c0_22, %c0_23] : memref<1x1x128xf32, #tpu.memory_space<vmem>>, vector<1x1x128xf32>
    %47 = vector.shape_cast %46 : vector<1x1x128xf32> to vector<1x128xf32>
    %48 = arith.mulf %30, %45 : vector<1x128xf32>
    %49 = arith.subf %47, %48 : vector<1x128xf32>
    %50 = vector.broadcast %45 : vector<1x128xf32> to vector<8x128xf32>
    %51 = arith.mulf %26, %50 : vector<8x128xf32>
    %52 = vector.broadcast %49 : vector<1x128xf32> to vector<8x128xf32>
    %53 = arith.addf %51, %52 : vector<8x128xf32>
    %c0_24 = arith.constant 0 : index
    %c0_25 = arith.constant 0 : index
    %c0_26 = arith.constant 0 : index
    %54 = vector.load %arg4[%c0_24, %c0_25, %c0_26] : memref<1x128x128xf32, #tpu.memory_space<vmem>>, vector<1x128x128xf32>
    %55 = vector.shape_cast %54 : vector<1x128x128xf32> to vector<128x128xf32>
    %cst_27 = arith.constant dense<0.000000e+00> : vector<8x128xf32>
    %56 = tpu.matmul %53, %55, %cst_27 {dimension_numbers = #tpu.dot_dimension_numbers<[1], [0], [0], [1], [0, 0, 1, 1], [], []>} : vector<8x128xf32>, vector<128x128xf32>, vector<8x128xf32> -> vector<8x128xf32>
    %c0_28 = arith.constant 0 : index
    %c0_29 = arith.constant 0 : index
    %c0_30 = arith.constant 0 : index
    %57 = vector.load %arg5[%c0_28, %c0_29, %c0_30] : memref<1x1x128xf32, #tpu.memory_space<vmem>>, vector<1x1x128xf32>
    %58 = vector.shape_cast %57 : vector<1x1x128xf32> to vector<1x128xf32>
    %59 = vector.broadcast %58 : vector<1x128xf32> to vector<8x128xf32>
    %60 = arith.addf %56, %59 : vector<8x128xf32>
    %c2_i32_31 = arith.constant 2 : i32
    %61 = arith.cmpi eq, %arg0, %c2_i32_31 : i32
    %true = arith.constant true
    %62 = arith.xori %61, %true : i1
    %63 = arith.extui %62 : i1 to i32
    %c0_i32_32 = arith.constant 0 : i32
    %64 = arith.cmpi ne, %63, %c0_i32_32 : i32
    scf.if %64 {
      %67 = math.tanh %60 : vector<8x128xf32>
      %68 = arith.index_cast %23 : i32 to index
      %c0_34 = arith.constant 0 : index
      %c0_35 = arith.constant 0 : index
      %69 = vector.load %arg7[%68, %c0_34, %c0_35] : memref<2x8x128xf32, #tpu.memory_space<vmem>>, vector<1x8x128xf32>
      %70 = vector.shape_cast %69 : vector<1x8x128xf32> to vector<8x128xf32>
      %71 = vector.shape_cast %67 : vector<8x128xf32> to vector<1x8x128xf32>
      tpu.vector_store %arg7[%68, %c0_34, %c0_35], %71 {strides = array<i32>} : memref<2x8x128xf32, #tpu.memory_space<vmem>>, vector<1x8x128xf32>,
    } else {
    }
    %65 = arith.extui %61 : i1 to i32
    %c0_i32_33 = arith.constant 0 : i32
    %66 = arith.cmpi ne, %65, %c0_i32_33 : i32
    scf.if %66 {
      %67 = tpu.iota {dimensions = array<i32: 1>} : vector<8x128xi32>
      %c4_i32 = arith.constant 4 : i32
      %68 = vector.broadcast %c4_i32 : i32 to vector<8x128xi32>
      %69 = arith.cmpi slt, %67, %68 : vector<8x128xi32>
      %cst_34 = arith.constant 0xFF800000 : f32
      %70 = vector.broadcast %cst_34 : f32 to vector<8x128xf32>
      %71 = arith.select %69, %60, %70 : vector<8x128xi1>, vector<8x128xf32>
      %cst_35 = arith.constant dense<0xFF800000> : vector<8xf32>
      %72 = vector.multi_reduction <maximumf>, %71, %cst_35 [1] : vector<8x128xf32> to vector<8xf32>
      %73 = vector.shape_cast %72 : vector<8xf32> to vector<8x1xf32>
      %74 = vector.broadcast %73 : vector<8x1xf32> to vector<8x128xf32>
      %75 = arith.subf %71, %74 : vector<8x128xf32>
      %76 = math.exp %75 : vector<8x128xf32>
      %cst_36 = arith.constant dense<0.000000e+00> : vector<8xf32>
      %77 = vector.multi_reduction <add>, %76, %cst_36 [1] : vector<8x128xf32> to vector<8xf32>
      %78 = vector.shape_cast %77 : vector<8xf32> to vector<8x1xf32>
      %79 = tpu.reciprocal %78 {approx = true} : vector<8x1xf32> -> vector<8x1xf32>
      %80 = vector.broadcast %79 : vector<8x1xf32> to vector<8x128xf32>
      %81 = arith.mulf %76, %80 : vector<8x128xf32>
      %c0_37 = arith.constant 0 : index
      %c0_38 = arith.constant 0 : index
      %82 = vector.load %arg6[%c0_37, %c0_38] : memref<8x128xf32, #tpu.memory_space<vmem>>, vector<8x128xf32>
      tpu.vector_store %arg6[%c0_37, %c0_38], %81 {strides = array<i32>} : memref<8x128xf32, #tpu.memory_space<vmem>>, vector<8x128xf32>,
    } else {
    }
    return
  }
  func.func @transform_0(%arg0: i32) -> (i32, i32) {
    %c0_i32 = arith.constant 0 : i32
    %c0_i32_0 = arith.constant 0 : i32
    %c0_i32_1 = arith.constant 0 : i32
    return %c0_i32, %c0_i32_0 : i32, i32
  }
  func.func @transform_1(%arg0: i32) -> (i32, i32, i32) {
    %c0_i32 = arith.constant 0 : i32
    %c0_i32_0 = arith.constant 0 : i32
    %c0_i32_1 = arith.constant 0 : i32
    return %arg0, %c0_i32, %c0_i32_0 : i32, i32, i32
  }
  func.func @transform_2(%arg0: i32) -> (i32, i32, i32) {
    %c0_i32 = arith.constant 0 : i32
    %c0_i32_0 = arith.constant 0 : i32
    %c0_i32_1 = arith.constant 0 : i32
    return %arg0, %c0_i32, %c0_i32_0 : i32, i32, i32
  }
  func.func @transform_3(%arg0: i32) -> (i32, i32, i32) {
    %c0_i32 = arith.constant 0 : i32
    %c0_i32_0 = arith.constant 0 : i32
    %c0_i32_1 = arith.constant 0 : i32
    return %arg0, %c0_i32, %c0_i32_0 : i32, i32, i32
  }
  func.func @transform_4(%arg0: i32) -> (i32, i32, i32) {
    %c0_i32 = arith.constant 0 : i32
    %c0_i32_0 = arith.constant 0 : i32
    %c0_i32_1 = arith.constant 0 : i32
    return %arg0, %c0_i32, %c0_i32_0 : i32, i32, i32
  }
  func.func @transform_5(%arg0: i32) -> (i32, i32) {
    %c0_i32 = arith.constant 0 : i32
    %c0_i32_0 = arith.constant 0 : i32
    %c0_i32_1 = arith.constant 0 : i32
    return %c0_i32, %c0_i32_0 : i32, i32
  }
}

</mosaic_0001>

<bundles_post_ra>
// kernel: tpu_custom_call.1
= control target key start
LH: loop header
LB: loop body
LE: loop exit
PB: predicated region body
PF: predicated region fallthrough
CT: control target
= control target key end

     0   :  { %10 = vsyncpa [#allocation4], 0  ;;  %s1127_s0 = inlined_call_operand.hbm [shape: f32[8,128], index: 0, kind: input, shape index: {}]   ;;  %s1128_s1 = inlined_call_operand.hbm [shape: f32[3,1,128], index: 1, kind: input, shape index: {}]   ;;  %s1129_s2 = inlined_call_operand.hbm [shape: f32[3,1,128], index: 2, kind: input, shape index: {}]   ;;  %s1130_s3 = inlined_call_operand.hbm [shape: f32[3,128,128], index: 3, kind: input, shape index: {}]   ;;  %s1131_s4 = inlined_call_operand.vmem [shape: f32[3,1,128], index: 4, kind: input, shape index: {}]   ;;  %s1132_s5 = inlined_call_operand.hbm [shape: f32[8,128], index: 5, kind: output, shape index: {}]  }
   0x1   :  { %11 = vsyncpa [#allocation7], 0 }
   0x2   :  { %13 = vsyncpa [#allocation7 + $0x1], 0 }
   0x3   :  { %14 = vsyncpa [#allocation10], 0 }
   0x4   :  { %16 = vsyncpa [#allocation10 + $0x1], 0 }
   0x5   :  { %17 = vsyncpa [#allocation5], 0  ;;  %s910_s18 = smov 0   ;;  %s912_s19 = smov 0  }
   0x6   :  { %s914_s20 = smov 0   ;;  %s916_s21 = smov 0  }
   0x7 LB: > { %s931_s22 = sadd.s32 1, %s874_s21   ;;  %s51_s23 = sadd.s32 1, %s870_s20  ;;  %s874_s21 = sphi %s916_s21, %s1139_s21   ;;  %s870_s20 = sphi %s914_s20, %s1138_s20   ;;  %s866_s19 = sphi %s912_s19, %s1137_s19   ;;  %s862_s18 = sphi %s910_s18, %s1136_s18  }
   0x8   : > { %s48_s24 = ssub.s32 %s874_s21, %s931_s22  ;;  %p58_p0 = scmp.ne.s32.totalorder %s870_s20, %s866_s19 }
   0x9   : > { %p49_p1 = scmp.eq.s32.totalorder %s48_s24, 0  ;;  %p59_p2 = scmp.eq.s32.totalorder %s874_s21, 0 }
   0xa   : > { %p631_p3 = scmp.lt.s32.totalorder %s874_s21, 3  ;;  %s199_s26 = sand.u32 1, %s874_s21  }
   0xb   : > { %s941_s25 = scalar_select %p49_p1, %s870_s20, %s51_s23  }
   0xc   : > { %p60_p4 = por %p59_p2, %p58_p0  ;;  %s945_s27 = sand.u32 1, %s870_s20  }
   0xd   : > { %s205_s30 = scalar_lea.hbm %s1128_s1, %s874_s21  ;;  %s202_s7 = scalar_lea.vmem [#allocation6], %s945_s27 }
   0xe   : > { %s207_s6 = sshll.u32 %s205_s30, 4  ;;  %s209_s8 = sshll.u32 %s202_s7, 4  ;;  %s208_s6 = int_to_ptr.hbm [resolvable:$true] %s207_s6  ;;  %s210_s8 = int_to_ptr.vmem [resolvable:$true] %s209_s8 }
   0xf   : > { %p952_p5 = pnand %p631_p3, %p60_p4  ;;  %s957_s10 = sadd.s32 4294967295, %s874_s21  }
  0x10   : > { %p64_p6 = scmp.ne.s32.totalorder %s866_s19, %s862_s18  ;;  %s961_s11 = scalar_lea.sflag [#allocation7], %s199_s26 }
  0x11   : > { %s680_s12 = sshra.s32 %s208_s6, 4  ;;  %p684_p8 = pneg %p952_p5  ;;  %s681_s12 = int_to_ptr.hbm [resolvable:$true] %s680_s12 }
  0x12   : > { %s682_s13 = scalar_lea.hbm %s681_s12, 1  ;;  %s687_s16 = scalar_lea.hbm %s1128_s1, 3 }
  0x13   : > { %p683_p7 = scmp.ne.s32.totalorder %s681_s12, %s682_s13  ;;  %p688_p11 = scmp.lt.s32.totalorder %s681_s12, %s1128_s1 }
  0x14   : > { %p689_p12 = scmp.lt.s32.totalorder %s687_s16, %s682_s13 }
  0x15   : > { %p685_p9 = pnand %p684_p8, %p683_p7 }
  0x16   : > { %p690_p13 = por %p689_p12, %p688_p11 }
  0x17   : > { %p686_p10 = pneg %p685_p9 }
  0x19   : > { %p691_p0 = pnand %p690_p13, %p686_p10 }
  0x1b   : > { %694 = shalt.err (!%p691_p0)
}
  0x1c   : > { %623 = dma.hbm_to_vmem [thread:$0]  (!%p952_p5), %s208_s6, 16, %s210_s8, %s961_s11  }
  0x1d   : > { %p65_p1 = scmp.eq.s32.totalorder %s957_s10, 0  ;;  %p580_p2 = scmp.ge.s32.totalorder %s874_s21, 1 }
  0x1e   : > { %p174_p3 = scmp.lt.s32.totalorder %s874_s21, 4  ;;  %p581_p4 = scmp.ne.s32.totalorder %s957_s10, 0 }
  0x1f   : > { %p986_p7 = por %p65_p1, %p64_p6  ;;  %s186_s29 = sshll.u32 %s1127_s0, 4  ;;  %s187_s29 = int_to_ptr.hbm [resolvable:$true] %s186_s29 }
  0x20   : > { %p993_p9 = pnand %p580_p2, %p174_p3  ;;  %s876_s6 = smov [#allocation3]  }
  0x21   : > { %s188_s18 = sshll.u32 %s876_s6, 4  ;;  %s222_s12 = scalar_lea.hbm %s1129_s2, %s874_s21  ;;  %s189_s18 = int_to_ptr.vmem [resolvable:$true] %s188_s18 }
  0x22   : > { %p616_p10 = pneg %p993_p9  ;;  %s224_s13 = sshll.u32 %s222_s12, 4  ;;  %s225_s13 = int_to_ptr.hbm [resolvable:$true] %s224_s13 }
  0x23   : > { %s219_s14 = scalar_lea.vmem [#allocation8], %s945_s27  ;;  %s740_s16 = sshra.s32 %s225_s13, 4  ;;  %s741_s16 = int_to_ptr.hbm [resolvable:$true] %s740_s16 }
  0x24   : > { %p617_p6 = pnand %p616_p10, %p65_p1  ;;  %s226_s15 = sshll.u32 %s219_s14, 4  ;;  %s227_s15 = int_to_ptr.vmem [resolvable:$true] %s226_s15 }
  0x25   : > { %s742_s17 = scalar_lea.hbm %s741_s16, 1  ;;  %s747_s28 = scalar_lea.hbm %s1129_s2, 3 }
  0x26   : > { %619 = dma.hbm_to_vmem [thread:$0]  (!%p617_p6), %s187_s29, 128, %s189_s18, [#allocation4]  }
  0x27   : > { %p743_p11 = scmp.ne.s32.totalorder %s741_s16, %s742_s17  ;;  %p748_p0 = scmp.lt.s32.totalorder %s741_s16, %s1129_s2 }
  0x28   : > { %p749_p2 = scmp.lt.s32.totalorder %s747_s28, %s742_s17 }
  0x29   : > { %p745_p12 = pnand %p743_p11, %p684_p8 }
  0x2a   : > { %p750_p3 = por %p749_p2, %p748_p0 }
  0x2b   : > { %p746_p13 = pneg %p745_p12 }
  0x2d   : > { %p751_p10 = pnand %p750_p3, %p746_p13 }
  0x2f   : > { %754 = shalt.err (!%p751_p10)
}
  0x30   : > { %626 = dma.hbm_to_vmem [thread:$0]  (!%p952_p5), %s225_s13, 16, %s227_s15, %s961_s11  }
  0x31   : > { %s583_s29 = sshll.u32 %s945_s27, 7  ;;  %s601_s18 = sshll.u32 %s874_s21, 7 }
  0x32   : > { %s242_s14 = scalar_lea.hbm %s1130_s3, %s601_s18  ;;  %s237_s23 = scalar_lea.vmem [#allocation9], %s583_s29 }
  0x33   : > { %s245_s16 = sshll.u32 %s237_s23, 4  ;;  %s243_s17 = sshll.u32 %s242_s14, 4  ;;  %s246_s16 = int_to_ptr.vmem [resolvable:$true] %s245_s16  ;;  %s244_s17 = int_to_ptr.hbm [resolvable:$true] %s243_s17 }
  0x34   : > { %s234_s26 = scalar_lea.sflag [#allocation10], %s945_s27  ;;  %s770_s28 = sshra.s32 %s244_s17, 4  ;;  %s771_s28 = int_to_ptr.hbm [resolvable:$true] %s770_s28 }
  0x35   : > { %s772_s6 = scalar_lea.hbm %s771_s28, 128  ;;  %s777_s13 = scalar_lea.hbm %s1130_s3, 384 }
  0x36   : > { %p773_p6 = scmp.ne.s32.totalorder %s771_s28, %s772_s6  ;;  %p778_p13 = scmp.lt.s32.totalorder %s771_s28, %s1130_s3 }
  0x37   : > { %p779_p0 = scmp.lt.s32.totalorder %s777_s13, %s772_s6 }
  0x38   : > { %p775_p11 = pnand %p773_p6, %p684_p8 }
  0x39   : > { %p780_p2 = por %p779_p0, %p778_p13 }
  0x3a   : > { %p776_p12 = pneg %p775_p11 }
  0x3c   : > { %p781_p3 = pnand %p780_p2, %p776_p12 }
  0x3e   : > { %784 = shalt.err (!%p781_p3)
}
  0x3f   : > { %s877_s27 = smov 128   ;;  %s878_s29 = smov 8  }
  0x40   : > { %629 = dma.hbm_to_vmem [thread:$0]  (!%p952_p5), %s244_s17, 2048, %s246_s16, %s234_s26, %s877_s27, %s877_s27, %s878_s29  }
  0x41   : > { %263 = sbr.rel (%p993_p9) target bundleno = 553 (0x229), region = 40 }
  0x46   : > { %845 = dma.done.wait (%p65_p1), [#allocation4], 128  }
  0x47   : > { %847 = vsyncadd (%p65_p1), [#allocation4], 4294967168  ;;  %s270_s18 = sand.u32 1, %s957_s10   ;;  %s1043_s8 = sand.u32 1, %s866_s19  }
  0x48   : > { %s271_s12 = scalar_lea.sflag [#allocation7], %s270_s18  ;;  %s273_s14 = scalar_lea.vmem [#allocation6], %s1043_s8 }
  0x49   : > { %849 = dma.done.wait (%p986_p7), %s271_s12, 32  }
  0x4a   : > { %851 = vsyncadd (%p986_p7), %s271_s12, 4294967264  ;;  %s588_s9 = sshll.u32 %s1043_s8, 7  ;;  %s282_s30 = scalar_lea.vmem [#allocation8], %s1043_s8 }
  0x4b   : > { %s289_s23 = scalar_lea.sflag [#allocation10], %s1043_s8  ;;  %s1053_s16 = scalar_lea.vmem [#allocation9], %s588_s9 }
  0x4c   : > { %853 = dma.done.wait (%p986_p7), %s289_s23, 2048  }
  0x4d   : > { %855 = vsyncadd (%p986_p7), %s289_s23, 4294965248  ;;  %p326_p5 = scmp.lt.s32.totalorder %s957_s10, 2  ;;  %332 = sbr.rel (%p581_p4) target bundleno = 84 (0x54), region = 60 }
  0x4f   : > { %s1061_s17 = scalar_select %p326_p5, %s957_s10, 2 }
  0x51   : > { %s328_s6 = scalar_lea.vmem %s1131_s4, %s1061_s17 }
  0x52   : > { %v333_v0 = vld [vmem:[#allocation3] sm:$0xff] }
  0x53   : > { %335 = vst [vmem:[#allocation2 + $0x8] sm:$0xff] %v333_v0 }
  0x54 PF: > { %v409_v1 = vld [vmem:[%s1053_s16 + $0x78] sm:$0xff]  ;;  %v408_v2 = vld [vmem:[%s1053_s16 + $0x70] sm:$0xff]  ;;  %p336_p8 = scmp.lt.s32.totalorder %s957_s10, 0  ;;  %s337_s24 = ssub.s32 0, %s957_s10  ;;  %v407_v3 = vld [vmem:[%s1053_s16 + $0x68] sm:$0xff] }
  0x55   : > { %414 = vmatpush.msra.mxu0 %v409_v1  ;;  %s590_s11 = smin.u32 %s957_s10, %s337_s24  ;;  %v406_v4 = vld [vmem:[%s1053_s16 + $0x60] sm:$0xff]  ;;  %v405_v5 = vld [vmem:[%s1053_s16 + $0x58] sm:$0xff]  ;;  %v404_v6 = vld [vmem:[%s1053_s16 + $0x50] sm:$0xff]  ;;  %p594_p4 = scmp.eq.s32.totalorder %s957_s10, 2 }
  0x56   : > { %s339_s21 = sand.u32 1, %s590_s11   ;;  %v403_v7 = vld [vmem:[%s1053_s16 + $0x48] sm:$0xff]  ;;  %v402_v8 = vld [vmem:[%s1053_s16 + $0x40] sm:$0xff]  ;;  %v401_v10 = vld [vmem:[%s1053_s16 + $0x38] sm:$0xff] }
  0x57   : > { %415 = vmatpush.msra.mxu0 %v408_v2  ;;  %s340_s13 = ssub.s32 0, %s339_s21  ;;  %v400_v13 = vld [vmem:[%s1053_s16 + $0x30] sm:$0xff]  ;;  %v399_v16 = vld [vmem:[%s1053_s16 + $0x28] sm:$0xff]  ;;  %v398_v19 = vld [vmem:[%s1053_s16 + $0x20] sm:$0xff] }
  0x58   : > { %s1141_s13 = smov (!%p336_p8, %s340_s13), %s339_s21  ;;  %v397_v22 = vld [vmem:[%s1053_s16 + $0x18] sm:$0xff]  ;;  %v396_v25 = vld [vmem:[%s1053_s16 + $0x10] sm:$0xff]  ;;  %v395_v28 = vld [vmem:[%s1053_s16 + $0x8] sm:$0xff] }
  0x59   : > { %416 = vmatpush.msra.mxu0 %v407_v3  ;;  %p592_p1 = scmp.lt.s32.totalorder %s1141_s13, 0  ;;  %s346_s15 = sadd.s32 2, %s1141_s13  ;;  %v394_v31 = vld [vmem:[%s1053_s16] sm:$0xff] }
  0x5a   : > { %v370_v42 = vld [vmem:[%s273_s14] sm:$0x1] }
  0x5b   : > { %417 = vmatpush.msra.mxu0 %v406_v4  ;;  %s1143_s15 = smov (!%p592_p1, %s346_s15), %s1141_s13  ;;  %v383_v46 = vld [vmem:[%s282_s30] sm:$0x1] }
  0x5c   : > { %s348_s7 = ssub.s32 1, %s1143_s15  ;;  %v671_v53 = vld [vmem:[%s328_s6] ss:$0 sm:$0xff]  ;;  %s595_s8 = sshll.u32 (!%p594_p4), %s1143_s15, 3 }
  0x5d   : > { %418 = vmatpush.msra.mxu0 %v405_v5  ;;  %s593_s27 = sshll.u32 %s348_s7, 3  ;;  %s441_s14 = scalar_lea.vmem (!%p594_p4), [#allocation2], %s595_s8 }
  0x5e   : > { %s350_s29 = scalar_lea.vmem [#allocation2], %s593_s27 }
  0x5f   : > { %419 = vmatpush.msra.mxu0 %v404_v6  ;;  %v351_v9 = vld [vmem:[%s350_s29] sm:$0xff] }
  0x60   : > { %v352_v11 = vrot.slane %v351_v9, 4  ;;  %v359_v12 = vmul.f32 %v351_v9, %v351_v9 }
  0x61   : > { %420 = vmatpush.msra.mxu0 %v403_v7 }
  0x62   : > { %v353_v14 = vadd.f32 %v352_v11, %v351_v9  ;;  %v360_v15 = vrot.slane %v359_v12, 4 }
  0x63   : > { %421 = vmatpush.msra.mxu0 %v402_v8 }
  0x64   : > { %v354_v17 = vrot.slane %v353_v14, 2  ;;  %v361_v18 = vadd.f32 %v360_v15, %v359_v12 }
  0x65   : > { %422 = vmatpush.msra.mxu0 %v401_v10 }
  0x66   : > { %v355_v20 = vadd.f32 %v354_v17, %v353_v14  ;;  %v362_v21 = vrot.slane %v361_v18, 2 }
  0x67   : > { %423 = vmatpush.msra.mxu0 %v400_v13 }
  0x68   : > { %v356_v23 = vrot.slane %v355_v20, 1  ;;  %v363_v24 = vadd.f32 %v362_v21, %v361_v18 }
  0x69   : > { %424 = vmatpush.msra.mxu0 %v399_v16 }
  0x6a   : > { %v357_v26 = vadd.f32 %v356_v23, %v355_v20  ;;  %v364_v27 = vrot.slane %v363_v24, 1 }
  0x6b   : > { %425 = vmatpush.msra.mxu0 %v398_v19 }
  0x6c   : > { %v358_v29 = vmul.f32 0.125, %v357_v26  ;;  %v365_v30 = vadd.f32 %v364_v27, %v363_v24 }
  0x6d   : > { %426 = vmatpush.msra.mxu0 %v397_v22 }
  0x6e   : > { %v366_v32 = vmul.f32 0.125, %v365_v30  ;;  %v367_v33 = vmul.f32 %v358_v29, %v358_v29 }
  0x6f   : > { %427 = vmatpush.msra.mxu0 %v396_v25 }
  0x70   : > { %v368_v34 = vsub.f32 %v366_v32, %v367_v33 }
  0x71   : > { %428 = vmatpush.msra.mxu0 %v395_v28 }
  0x72   : > { %v369_v35 = vmax.f32 %v368_v34, 0.0 }
  0x73   : > { %429 = vmatpush.msra.mxu0 %v394_v31 }
  0x74   : > { %v371_v36 = vadd.f32 1e-05, %v369_v35 }
  0x76   : > { %672 = vrsqrt.f32 %v371_v36  ;;  %vm378_vm0 = vweird.f32 %v371_v36 }
  0x7c   : > { %v673_v37 = vpop.eup %672 }
  0x7d   : > { %v373_v38 = vmul.f32 %v673_v37, %v371_v36  ;;  %vm379_vm1 = vweird.f32 %v673_v37 }
  0x7e   : > { %vm380_vm2 = vmor %vm378_vm0, %vm379_vm1 }
  0x7f   : > { %v374_v39 = vmul.f32 %v673_v37, %v373_v38 }
  0x81   : > { %v375_v40 = vmul.f32 0.5, %v374_v39 }
  0x83   : > { %v376_v41 = vsub.f32 1.5, %v375_v40 }
  0x85   : > { %v377_v43 = vmul.f32 %v673_v37, %v376_v41 }
  0x87   : > { %v381_v44 = vsel %vm380_vm2, %v673_v37, %v377_v43 }
  0x88   : > { %v382_v45 = vmul.f32 %v381_v44, %v370_v42 }
  0x8a   : > { %v384_v47 = vmul.f32 %v382_v45, %v358_v29  ;;  %v387_v48 = vperm.slane %v382_v45, 0 }
  0x8c   : > { %v385_v49 = vsub.f32 %v383_v46, %v384_v47  ;;  %v389_v50 = vmul.f32 %v387_v48, %v351_v9 }
  0x8e   : > { %v391_v51 = vperm.slane %v385_v49, 0 }
  0x90   : > { %v393_v52 = vadd.f32 %v391_v51, %v389_v50 }
  0x92   : > { %430 = vmatmul.f32.vlgmr.msra.gmra.mxu0 %v393_v52 }
 0x10c   : > { %438 = sbr.rel (%p594_p4) target bundleno = 282 (0x11a), region = 64 }
 0x10f   : > { %v431_v54 = vpop.f32.mrf.mxu0 }
 0x110   : > { %v432_v55 = vadd.f32 %v671_v53, %v431_v54 }
 0x112   : > { %674 = vtanh.f32 %v432_v55 }
 0x118   : > { %v675_v56 = vpop.eup %674 }
 0x119   : > { %442 = vst [vmem:[%s441_s14] sm:$0xff] %v675_v56 }
 0x11a PF: > { %p596_p7 = scmp.ne.s32.totalorder %s957_s10, 2 }
 0x11c   : > { %445 = sbr.rel (%p596_p7) target bundleno = 548 (0x224), region = 68 }
 0x121   : > { %v446_v57 = vlaneseq }
 0x123   : > { %v447_v58 = vand.u32 127, %v446_v57 }
 0x125   : > { %vm448_vm3 = vcmp.lt.s32.totalorder %v447_v58, 4 }
 0x126   : > { %v449_v59 = vsel %vm448_vm3, %v432_v55, -inf }
 0x127   : > { %450 = vmax.xlane.f32.xlu0 %v449_v59 }
 0x19a   : > { %v451_v60 = vpop.xlane.xlu0 %450 }
 0x19b   : > { %v452_v61 = vsub.f32 %v449_v59, %v451_v60 }
 0x19d   : > { %v453_v62 = vmul.f32 1.442695, %v452_v61 }
 0x19f   : > { %676 = vpow2.f32 %v453_v62 }
 0x1a5   : > { %v677_v63 = vpop.eup %676 }
 0x1a6   : > { %455 = vadd.xlane.f32.xlu0 %v677_v63 }
 0x219   : > { %v456_v0 = vpop.xlane.xlu0 %455 }
 0x21a   : > { %678 = vrcp.f32 %v456_v0 }
 0x220   : > { %v679_v1 = vpop.eup %678 }
 0x221   : > { %v458_v2 = vmul.f32 %v679_v1, %v677_v63 }
 0x223   : > { %459 = vst [vmem:[#allocation11] sm:$0xff] %v458_v2 }
 0x224 PF: > { %s468_s23 = sshll.u32 %s1132_s5, 4  ;;  %s879_s16 = smov [#allocation11]   ;;  %s469_s23 = int_to_ptr.hbm [resolvable:$true] %s468_s23 }
 0x225   : > { %s466_s17 = sshll.u32 %s879_s16, 4  ;;  %s467_s17 = int_to_ptr.vmem [resolvable:$true] %s466_s17 }
 0x226   : > { %613 = dma.vmem_to_hbm [thread:$0]  (%p594_p4), %s467_s17, 128, %s469_s23, [#allocation5]  }
 0x227   : > { %857 = dma.done.wait (%p594_p4), [#allocation5], 128  }
 0x228   : > { %859 = vsyncadd (%p594_p4), [#allocation5], 4294967168 }
 0x229 PF: > { %p20_p9 = scmp.ge.s32.totalorder %s931_s22, 5   ;;  %s1136_s18 = smov %s866_s19 }
 0x22a   : > { %s1137_s19 = smov %s870_s20  ;;  %s1138_s20 = smov %s941_s25 }
 0x22b   : > { %s1139_s21 = smov %s931_s22  ;;  %22 = sbr.rel (!%p20_p9) target bundleno = 7 (0x7), region = 124 }
 0x230   :  { %482 = vsyncpa [#allocation4], 1 }
 0x231   :  { %484 = vsyncpa [#allocation4 + $0x1], 1 }
 0x232   :  { %485 = vsyncpa [#allocation7], 1 }
 0x233   :  { %487 = vsyncpa [#allocation7 + $0x1], 1 }
 0x234   :  { %488 = vsyncpa [#allocation10], 1 }
 0x235   :  { %490 = vsyncpa [#allocation10 + $0x1], 1 }
 0x236   :  { %491 = vsyncpa [#allocation5], 1 }
 0x237   :  { %493 = vsyncpa [#allocation5 + $0x1], 1 }

</bundles_post_ra>
